<compile_context>
chip_gen: v5e
topology: v5e:2x2
jax: 0.10.0
libtpu: 0.0.40
codegen_flags: <defaults>
</compile_context>

<pallas_src>
import jax
import jax.numpy as jnp
import numpy as np
from jax import lax
from jax.experimental import pallas as pl
from jax.experimental.pallas import tpu as pltpu

NEG = -1e30     # finite stand-in for -inf (keeps the log-sum-exp NaN/Inf free)
LANES = 128


def _ctc_kernel(pred_ref, ext_ref, allow_ref, tlen_ref, out_ref, em_t_ref):
    # pred_ref : (BB, T, C)   raw logits, input dtype (bf16 stays bf16 on MXU)
    # ext_ref  : (BB, Lp)     extended labels (blank=0 at even l), lane-padded
    # allow_ref: (BB, Lp)     int32 mask: skip transition (l-2 -> l) allowed
    # tlen_ref : (BB, 1)      int32 target lengths
    # out_ref  : (BB, 128)    per-sample (un-normalized) loss, lane-broadcast
    # em_t_ref : (T, BB, Lp)  f32 VMEM scratch, time-major extended emissions
    nb, T, C = pred_ref.shape
    Lp = ext_ref.shape[1]

    ext = ext_ref[...]                                           # (BB, Lp)
    allow = allow_ref[...] > 0                                   # (BB, Lp) bool
    tlen = tlen_ref[...]                                         # (BB, 1)

    # One-hot selector for the extended labels, built ONCE in the input dtype
    # so the gather runs as a native (bf16) MXU matmul when pred is bf16.
    # Selection by 0/1 is exact; accumulation is forced to f32 below.
    c_iota = lax.broadcasted_iota(jnp.int32, (nb, C, Lp), 1)
    sel = (c_iota == ext[:, None, :]).astype(pred_ref.dtype)     # (BB, C, Lp)

    l_iota = lax.broadcasted_iota(jnp.int32, (nb, Lp), 1)        # (BB, Lp)
    valid = l_iota < (2 * tlen + 1)                              # (BB, Lp)

    # --- build the time-major emission table em_t[t, b, l] directly into the
    # VMEM scratch, in time chunks, so only ONE copy of the (T, BB, Lp) tensor
    # plus a bounded chunk temporary is ever live (no em/em_t duplication and
    # no persistent f32 copy of the (BB, T, C) logits).
    tc = 128 if (T >= 256 and T % 8 == 0) else T
    for t0 in range(0, T, tc):
        ts = min(tc, T - t0)
        xs = pred_ref[:, t0:t0 + ts, :]                          # (BB, ts, C)
        # streamed log-softmax denominator; only the reduction path is f32
        m = jnp.max(xs, axis=-1, keepdims=True).astype(jnp.float32)
        ssum = jnp.sum(jnp.exp(xs.astype(jnp.float32) - m),
                       axis=-1, keepdims=True)
        lse = m + jnp.log(ssum)                                  # (BB, ts, 1)
        # fused one-hot gather: emc[b,t,l] = logits[b,t,ext[b,l]] - lse[b,t]
        emc = jnp.einsum("btc,bcl->btl", xs, sel,
                         preferred_element_type=jnp.float32) - lse
        # bake per-sample validity (l < 2*tlen + 1) into the emissions once
        emc = jnp.where(valid[:, None, :], emc, NEG)
        em_t_ref[t0:t0 + ts] = pltpu.einshape("btl->tbl", emc)   # (ts, BB, Lp)

    # --- CTC alpha (forward) recursion: one (BB, Lp) tile per time step ------
    mask1 = l_iota >= 1                                          # hoisted mask

    e0 = em_t_ref[0]
    init_mask = (l_iota == 0) | ((l_iota == 1) & (tlen > 0))
    alpha = jnp.where(init_mask, e0, NEG)                        # (BB, Lp)

    def step(t, alpha):
        e = em_t_ref[t]                                          # (BB, Lp) load
        a1 = jnp.where(mask1, pltpu.roll(alpha, shift=1, axis=1), NEG)  # alpha[l-1]
        a2 = jnp.where(allow, pltpu.roll(alpha, shift=2, axis=1), NEG)  # alpha[l-2]
        mx = jnp.maximum(jnp.maximum(alpha, a1), a2)
        s = jnp.exp(alpha - mx) + jnp.exp(a1 - mx) + jnp.exp(a2 - mx)
        return e + mx + jnp.log(s)

    # BB >= 32 already gives 4 independent (8,128) chains per step; keep the
    # unroll modest so alpha/a1/a2/mx/s temporaries stay within the vreg file.
    if T <= 32:
        unroll = True
    else:
        unroll = 2 if nb >= 32 else 4
    alpha = lax.fori_loop(1, T, step, alpha, unroll=unroll)

    # loss = -logsumexp(alpha[2*tlen], alpha[2*tlen - 1])
    last = 2 * tlen                                              # (BB, 1)
    fin_mask = (l_iota == last) | ((l_iota == last - 1) & (tlen > 0))
    fin = jnp.where(fin_mask, alpha, NEG)
    mx = jnp.max(fin, axis=-1, keepdims=True)                    # (BB, 1)
    ll = mx + jnp.log(jnp.sum(jnp.exp(fin - mx), axis=-1, keepdims=True))
    loss = -ll
    loss = jnp.where(ll < -1e29, jnp.zeros_like(loss), loss)     # zero_infinity
    out_ref[...] = jnp.broadcast_to(loss, (nb, LANES))           # lane-dense


def _prepare_labels(target):
    """Tiny O(B*L) label preprocessing: extended labels + skip-allowed mask."""
    B, S = target.shape
    L = 2 * S + 1
    l = jnp.arange(L)
    s_idx = jnp.maximum((l - 1) // 2, 0)                 # label slot for odd l
    is_odd = (l % 2) == 1
    cur = jnp.take(target, s_idx, axis=1)                # (B, L)
    prv = jnp.take(target, jnp.maximum(s_idx - 1, 0), axis=1)
    ext = jnp.where(is_odd[None, :], cur, 0).astype(jnp.int32)
    # skip (l-2 -> l) allowed only at odd l >= 3 with a non-blank label that
    # differs from the previous label (matches nn.CTCLoss alpha rules).
    allow = is_odd[None, :] & (s_idx[None, :] >= 1) & (cur != prv) & (cur != 0)
    return ext, allow.astype(jnp.int32)


def _vmem_estimate(bb, T, Cp, Lp, in_bytes):
    """Rough live-set estimate (bytes) incl. lane padding of the class axis."""
    tc = 128 if (T >= 256 and T % 8 == 0) else T
    return (2 * bb * T * Cp * in_bytes        # double-buffered logits block
            + bb * Cp * Lp * in_bytes         # one-hot selector
            + T * bb * Lp * 4                 # time-major emissions scratch
            + 2 * bb * tc * max(Cp, Lp) * 4   # per-chunk f32 temporaries
            + 16 * bb * Lp * 4)               # alpha recursion temporaries


def _pick_bb(B, T, Cp, Lp, in_bytes):
    """Widest batch block that fits a conservative VMEM budget (v7x's 64 MiB
    is the tightest) and, when the batch allows it, still yields >=2 grid
    programs so both v7x TensorCores get work."""
    budget = 40 << 20
    for bb in (32, 16, 8):
        if _vmem_estimate(bb, T, Cp, Lp, in_bytes) > budget:
            continue
        if pl.cdiv(B, bb) >= 2 or bb == 8:
            return bb
    return 8


def ctc_loss(pred, target, target_length, batch_size=None):
    """Matches CTCLoss.forward: log_softmax + nn.CTCLoss(blank=0, zero_infinity, 'mean')."""
    B, T, C = pred.shape
    S = target.shape[1]
    L = 2 * S + 1
    Lp = pl.cdiv(L, LANES) * LANES            # lane-pad the extended axis
    Cp = pl.cdiv(C, LANES) * LANES            # what the class axis costs in VMEM
    in_bytes = pred.dtype.itemsize

    BB = _pick_bb(B, T, Cp, Lp, in_bytes)
    Bp = pl.cdiv(B, BB) * BB                  # batch-pad to the block size

    target = target.astype(jnp.int32)
    target_length = target_length.astype(jnp.int32)
    pad_b = Bp - B
    pred_p = jnp.pad(pred, ((0, pad_b), (0, 0), (0, 0)))   # keep input dtype
    tgt_p = jnp.pad(target, ((0, pad_b), (0, 0)))
    tlen_p = jnp.pad(target_length, ((0, pad_b),))

    ext, allow = _prepare_labels(tgt_p)                    # (Bp, L)
    ext = jnp.pad(ext, ((0, 0), (0, Lp - L)))
    allow = jnp.pad(allow, ((0, 0), (0, Lp - L)))
    tlen2 = tlen_p.reshape(Bp, 1)

    est = _vmem_estimate(BB, T, Cp, Lp, in_bytes)
    vmem_limit = int(min(max(est + (16 << 20), 32 << 20), 64 << 20))

    cost = pl.CostEstimate(
        flops=int(2 * Bp * T * Cp * Lp + 12 * Bp * T * Lp),
        transcendentals=int(Bp * T * Cp + 4 * Bp * T * Lp),
        bytes_accessed=int(Bp * T * C * in_bytes + 2 * Bp * Lp * 4
                           + Bp * LANES * 4),
    )

    out = pl.pallas_call(
        _ctc_kernel,
        out_shape=jax.ShapeDtypeStruct((Bp, LANES), jnp.float32),
        grid=(Bp // BB,),
        in_specs=[
            pl.BlockSpec((BB, T, C), lambda i: (i, 0, 0)),     # logits block
            pl.BlockSpec((BB, Lp), lambda i: (i, 0)),          # extended labels
            pl.BlockSpec((BB, Lp), lambda i: (i, 0)),          # skip-allowed mask
            pl.BlockSpec((BB, 1), lambda i: (i, 0)),           # target lengths
        ],
        out_specs=pl.BlockSpec((BB, LANES), lambda i: (i, 0)), # lane-dense losses
        scratch_shapes=[pltpu.VMEM((T, BB, Lp), jnp.float32)], # time-major emissions
        compiler_params=pltpu.CompilerParams(
            dimension_semantics=("parallel",),                 # megacore-friendly
            vmem_limit_bytes=vmem_limit,
        ),
        cost_estimate=cost,
    )(pred_p, ext, allow, tlen2)

    per_sample = out[:B, 0]
    # reduction='mean': divide by (clamped) target lengths, then mean over batch
    denom = jnp.maximum(target_length.astype(jnp.float32), 1.0)
    return jnp.mean(per_sample / denom)
    # TODO(synk): all input_lengths == T is assumed (matches the module); a
    # per-sample input-length mask would be needed if that ever changes.


def _ctc_ref(pred, target, target_length):
    """Pure-numpy reference (same semantics as nn.CTCLoss, mean, blank=0)."""
    pred = np.asarray(pred, np.float64)
    target = np.asarray(target)
    tlen = np.asarray(target_length)
    B, T, _ = pred.shape
    logp = pred - pred.max(-1, keepdims=True)
    logp = logp - np.log(np.exp(logp).sum(-1, keepdims=True))
    losses = []
    for b in range(B):
        S = int(tlen[b])
        ext = [0]
        for s in range(S):
            ext += [int(target[b, s]), 0]
        L = len(ext)
        alpha = np.full(L, -np.inf)
        alpha[0] = logp[b, 0, ext[0]]
        if L > 1:
            alpha[1] = logp[b, 0, ext[1]]
        for t in range(1, T):
            new = np.full(L, -np.inf)
            for l in range(L):
                vals = [alpha[l]]
                if l >= 1:
                    vals.append(alpha[l - 1])
                if l >= 2 and ext[l] != 0 and ext[l] != ext[l - 2]:
                    vals.append(alpha[l - 2])
                m = max(vals)
                if m == -np.inf:
                    new[l] = -np.inf
                else:
                    new[l] = logp[b, t, ext[l]] + m + np.log(sum(np.exp(v - m) for v in vals))
            alpha = new
        vals = [alpha[L - 1]] + ([alpha[L - 2]] if L > 1 else [])
        m = max(vals)
        ll = -np.inf if m == -np.inf else m + np.log(sum(np.exp(v - m) for v in vals))
        loss = -ll
        if not np.isfinite(loss):
            loss = 0.0
        losses.append(loss / max(S, 1))
    return float(np.mean(losses))


if __name__ == "__main__":
    key = jax.random.PRNGKey(0)
    B, T, C, S = 2, 8, 32, 4          # batch, time steps, classes, max target len
    k1, k2 = jax.random.split(key)
    pred = jax.random.normal(k1, (B, T, C), jnp.float32)          # (B, T, C)
    target = jax.random.randint(k2, (B, S), 1, C)                 # labels in [1, C)
    target_length = jnp.array([4, 3], jnp.int32)

    cost = ctc_loss(pred, target, target_length, batch_size=B)
    cost = jax.block_until_ready(cost)

    ref = _ctc_ref(pred, target, target_length)
    np.testing.assert_allclose(float(cost), ref, rtol=1e-4, atol=1e-4)
    print("KERNEL_OK")
</pallas_src>

<mosaic_0001>
module attributes {stable_mosaic.version = 11 : i64} {
  func.func @_ctc_kernel(%arg0: i32, %arg1: memref<8x8x32xf32, #tpu.memory_space<vmem>>, %arg2: memref<8x128xi32, #tpu.memory_space<vmem>>, %arg3: memref<8x128xi32, #tpu.memory_space<vmem>>, %arg4: memref<8x1xi32, #tpu.memory_space<vmem>>, %arg5: memref<8x128xf32, #tpu.memory_space<vmem>>, %arg6: memref<8x8x128xf32, #tpu.memory_space<vmem>>) attributes {dimension_semantics = [#tpu.dimension_semantics<parallel>], iteration_bounds = array<i64: 1>, scalar_prefetch = 0 : i64, scratch_operands = 1 : i64, tpu.core_type = #tpu.core_type<tc>, window_params = [{transform_indices = @transform_0, window_bounds = array<i64: 8, 8, 32>}, {transform_indices = @transform_1, window_bounds = array<i64: 8, 128>}, {transform_indices = @transform_2, window_bounds = array<i64: 8, 128>}, {transform_indices = @transform_3, window_bounds = array<i64: 8, 1>}, {transform_indices = @transform_4, window_bounds = array<i64: 8, 128>}]} {
    %c0 = arith.constant 0 : index
    %c0_0 = arith.constant 0 : index
    %0 = vector.load %arg2[%c0, %c0_0] : memref<8x128xi32, #tpu.memory_space<vmem>>, vector<8x128xi32>
    %c0_1 = arith.constant 0 : index
    %c0_2 = arith.constant 0 : index
    %1 = vector.load %arg3[%c0_1, %c0_2] : memref<8x128xi32, #tpu.memory_space<vmem>>, vector<8x128xi32>
    %c0_i32 = arith.constant 0 : i32
    %2 = vector.broadcast %c0_i32 : i32 to vector<8x128xi32>
    %3 = arith.cmpi sgt, %1, %2 : vector<8x128xi32>
    %c0_3 = arith.constant 0 : index
    %c0_4 = arith.constant 0 : index
    %4 = vector.load %arg4[%c0_3, %c0_4] : memref<8x1xi32, #tpu.memory_space<vmem>>, vector<8x1xi32>
    %5 = tpu.iota {dimensions = array<i32: 1>} : vector<8x32x128xi32>
    %6 = vector.shape_cast %0 : vector<8x128xi32> to vector<8x1x128xi32>
    %7 = vector.broadcast %6 : vector<8x1x128xi32> to vector<8x32x128xi32>
    %8 = arith.cmpi eq, %5, %7 : vector<8x32x128xi32>
    %9 = arith.extui %8 : vector<8x32x128xi1> to vector<8x32x128xi32>
    %10 = arith.sitofp %9 : vector<8x32x128xi32> to vector<8x32x128xf32>
    %11 = tpu.iota {dimensions = array<i32: 1>} : vector<8x128xi32>
    %c2_i32 = arith.constant 2 : i32
    %12 = vector.broadcast %c2_i32 : i32 to vector<8x1xi32>
    %13 = arith.muli %12, %4 : vector<8x1xi32>
    %c1_i32 = arith.constant 1 : i32
    %14 = vector.broadcast %c1_i32 : i32 to vector<8x1xi32>
    %15 = arith.addi %13, %14 : vector<8x1xi32>
    %16 = vector.broadcast %15 : vector<8x1xi32> to vector<8x128xi32>
    %17 = arith.cmpi slt, %11, %16 : vector<8x128xi32>
    %c0_5 = arith.constant 0 : index
    %c0_6 = arith.constant 0 : index
    %c0_7 = arith.constant 0 : index
    %18 = vector.load %arg1[%c0_5, %c0_6, %c0_7] : memref<8x8x32xf32, #tpu.memory_space<vmem>>, vector<8x8x32xf32>
    %cst = arith.constant dense<0xFF800000> : vector<8x8xf32>
    %19 = vector.multi_reduction <maximumf>, %18, %cst [2] : vector<8x8x32xf32> to vector<8x8xf32>
    %20 = vector.shape_cast %19 : vector<8x8xf32> to vector<8x8x1xf32>
    %21 = vector.broadcast %20 : vector<8x8x1xf32> to vector<8x8x32xf32>
    %22 = arith.subf %18, %21 : vector<8x8x32xf32>
    %23 = math.exp %22 : vector<8x8x32xf32>
    %cst_8 = arith.constant dense<0.000000e+00> : vector<8x8xf32>
    %24 = vector.multi_reduction <add>, %23, %cst_8 [2] : vector<8x8x32xf32> to vector<8x8xf32>
    %25 = vector.shape_cast %24 : vector<8x8xf32> to vector<8x8x1xf32>
    %26 = math.log %25 : vector<8x8x1xf32>
    %27 = arith.addf %20, %26 : vector<8x8x1xf32>
    "tpu.trace_start"() <{level = 10 : i32, message = "btc,bcl->btl"}> : () -> ()
    %cst_9 = arith.constant dense<0.000000e+00> : vector<8x8x128xf32>
    %28 = tpu.matmul %18, %10, %cst_9 {dimension_numbers = #tpu.dot_dimension_numbers<[2], [1], [1], [2], [0, 0, 0, 1, 1, 2], [0], [0]>} : vector<8x8x32xf32>, vector<8x32x128xf32>, vector<8x8x128xf32> -> vector<8x8x128xf32>
    "tpu.trace_stop"() : () -> ()
    %29 = vector.broadcast %27 : vector<8x8x1xf32> to vector<8x8x128xf32>
    %30 = arith.subf %28, %29 : vector<8x8x128xf32>
    %31 = vector.shape_cast %17 : vector<8x128xi1> to vector<8x1x128xi1>
    %cst_10 = arith.constant -1.000000e+30 : f32
    %32 = vector.shape_cast %31 : vector<8x1x128xi1> to vector<8x1x128xi1>
    %33 = vector.broadcast %32 : vector<8x1x128xi1> to vector<8x8x128xi1>
    %34 = vector.broadcast %cst_10 : f32 to vector<8x8x128xf32>
    %35 = arith.select %33, %30, %34 : vector<8x8x128xi1>, vector<8x8x128xf32>
    %36 = tpu.transpose %35, [1, 0, 2] : vector<8x8x128xf32> -> vector<8x8x128xf32>
    %c0_11 = arith.constant 0 : index
    %c0_12 = arith.constant 0 : index
    %c0_13 = arith.constant 0 : index
    %37 = vector.load %arg6[%c0_11, %c0_12, %c0_13] : memref<8x8x128xf32, #tpu.memory_space<vmem>>, vector<8x8x128xf32>
    tpu.vector_store %arg6[%c0_11, %c0_12, %c0_13], %36 {strides = array<i32>} : memref<8x8x128xf32, #tpu.memory_space<vmem>>, vector<8x8x128xf32>,
    %c1_i32_14 = arith.constant 1 : i32
    %38 = vector.broadcast %c1_i32_14 : i32 to vector<8x128xi32>
    %39 = arith.cmpi sge, %11, %38 : vector<8x128xi32>
    %c0_15 = arith.constant 0 : index
    %c0_16 = arith.constant 0 : index
    %c0_17 = arith.constant 0 : index
    %40 = vector.load %arg6[%c0_15, %c0_16, %c0_17] : memref<8x8x128xf32, #tpu.memory_space<vmem>>, vector<1x8x128xf32>
    %41 = vector.shape_cast %40 : vector<1x8x128xf32> to vector<8x128xf32>
    %c0_i32_18 = arith.constant 0 : i32
    %42 = vector.broadcast %c0_i32_18 : i32 to vector<8x128xi32>
    %43 = arith.cmpi eq, %11, %42 : vector<8x128xi32>
    %c1_i32_19 = arith.constant 1 : i32
    %44 = vector.broadcast %c1_i32_19 : i32 to vector<8x128xi32>
    %45 = arith.cmpi eq, %11, %44 : vector<8x128xi32>
    %c0_i32_20 = arith.constant 0 : i32
    %46 = vector.broadcast %c0_i32_20 : i32 to vector<8x1xi32>
    %47 = arith.cmpi sgt, %4, %46 : vector<8x1xi32>
    %48 = vector.broadcast %47 : vector<8x1xi1> to vector<8x128xi1>
    %49 = arith.andi %45, %48 : vector<8x128xi1>
    %50 = arith.ori %43, %49 : vector<8x128xi1>
    %cst_21 = arith.constant -1.000000e+30 : f32
    %51 = vector.broadcast %cst_21 : f32 to vector<8x128xf32>
    %52 = arith.select %50, %41, %51 : vector<8x128xi1>, vector<8x128xf32>
    %c1_i32_22 = arith.constant 1 : i32
    %53 = arith.index_cast %c1_i32_22 : i32 to index
    %c0_23 = arith.constant 0 : index
    %c0_24 = arith.constant 0 : index
    %54 = vector.load %arg6[%53, %c0_23, %c0_24] : memref<8x8x128xf32, #tpu.memory_space<vmem>>, vector<1x8x128xf32>
    %55 = vector.shape_cast %54 : vector<1x8x128xf32> to vector<8x128xf32>
    %c1_i32_25 = arith.constant 1 : i32
    %56 = tpu.dynamic_rotate %52 by %c1_i32_25 dim 1 : vector<8x128xf32>, i32 -> vector<8x128xf32>
    %cst_26 = arith.constant -1.000000e+30 : f32
    %57 = vector.broadcast %cst_26 : f32 to vector<8x128xf32>
    %58 = arith.select %39, %56, %57 : vector<8x128xi1>, vector<8x128xf32>
    %c2_i32_27 = arith.constant 2 : i32
    %59 = tpu.dynamic_rotate %52 by %c2_i32_27 dim 1 : vector<8x128xf32>, i32 -> vector<8x128xf32>
    %cst_28 = arith.constant -1.000000e+30 : f32
    %60 = vector.broadcast %cst_28 : f32 to vector<8x128xf32>
    %61 = arith.select %3, %59, %60 : vector<8x128xi1>, vector<8x128xf32>
    %62 = arith.maximumf %52, %58 : vector<8x128xf32>
    %63 = arith.maximumf %62, %61 : vector<8x128xf32>
    %64 = arith.subf %52, %63 : vector<8x128xf32>
    %65 = math.exp %64 : vector<8x128xf32>
    %66 = arith.subf %58, %63 : vector<8x128xf32>
    %67 = math.exp %66 : vector<8x128xf32>
    %68 = arith.addf %65, %67 : vector<8x128xf32>
    %69 = arith.subf %61, %63 : vector<8x128xf32>
    %70 = math.exp %69 : vector<8x128xf32>
    %71 = arith.addf %68, %70 : vector<8x128xf32>
    %72 = arith.addf %55, %63 : vector<8x128xf32>
    %73 = math.log %71 : vector<8x128xf32>
    %74 = arith.addf %72, %73 : vector<8x128xf32>
    %c2_i32_29 = arith.constant 2 : i32
    %75 = arith.index_cast %c2_i32_29 : i32 to index
    %c0_30 = arith.constant 0 : index
    %c0_31 = arith.constant 0 : index
    %76 = vector.load %arg6[%75, %c0_30, %c0_31] : memref<8x8x128xf32, #tpu.memory_space<vmem>>, vector<1x8x128xf32>
    %77 = vector.shape_cast %76 : vector<1x8x128xf32> to vector<8x128xf32>
    %c1_i32_32 = arith.constant 1 : i32
    %78 = tpu.dynamic_rotate %74 by %c1_i32_32 dim 1 : vector<8x128xf32>, i32 -> vector<8x128xf32>
    %cst_33 = arith.constant -1.000000e+30 : f32
    %79 = vector.broadcast %cst_33 : f32 to vector<8x128xf32>
    %80 = arith.select %39, %78, %79 : vector<8x128xi1>, vector<8x128xf32>
    %c2_i32_34 = arith.constant 2 : i32
    %81 = tpu.dynamic_rotate %74 by %c2_i32_34 dim 1 : vector<8x128xf32>, i32 -> vector<8x128xf32>
    %cst_35 = arith.constant -1.000000e+30 : f32
    %82 = vector.broadcast %cst_35 : f32 to vector<8x128xf32>
    %83 = arith.select %3, %81, %82 : vector<8x128xi1>, vector<8x128xf32>
    %84 = arith.maximumf %74, %80 : vector<8x128xf32>
    %85 = arith.maximumf %84, %83 : vector<8x128xf32>
    %86 = arith.subf %74, %85 : vector<8x128xf32>
    %87 = math.exp %86 : vector<8x128xf32>
    %88 = arith.subf %80, %85 : vector<8x128xf32>
    %89 = math.exp %88 : vector<8x128xf32>
    %90 = arith.addf %87, %89 : vector<8x128xf32>
    %91 = arith.subf %83, %85 : vector<8x128xf32>
    %92 = math.exp %91 : vector<8x128xf32>
    %93 = arith.addf %90, %92 : vector<8x128xf32>
    %94 = arith.addf %77, %85 : vector<8x128xf32>
    %95 = math.log %93 : vector<8x128xf32>
    %96 = arith.addf %94, %95 : vector<8x128xf32>
    %c3_i32 = arith.constant 3 : i32
    %97 = arith.index_cast %c3_i32 : i32 to index
    %c0_36 = arith.constant 0 : index
    %c0_37 = arith.constant 0 : index
    %98 = vector.load %arg6[%97, %c0_36, %c0_37] : memref<8x8x128xf32, #tpu.memory_space<vmem>>, vector<1x8x128xf32>
    %99 = vector.shape_cast %98 : vector<1x8x128xf32> to vector<8x128xf32>
    %c1_i32_38 = arith.constant 1 : i32
    %100 = tpu.dynamic_rotate %96 by %c1_i32_38 dim 1 : vector<8x128xf32>, i32 -> vector<8x128xf32>
    %cst_39 = arith.constant -1.000000e+30 : f32
    %101 = vector.broadcast %cst_39 : f32 to vector<8x128xf32>
    %102 = arith.select %39, %100, %101 : vector<8x128xi1>, vector<8x128xf32>
    %c2_i32_40 = arith.constant 2 : i32
    %103 = tpu.dynamic_rotate %96 by %c2_i32_40 dim 1 : vector<8x128xf32>, i32 -> vector<8x128xf32>
    %cst_41 = arith.constant -1.000000e+30 : f32
    %104 = vector.broadcast %cst_41 : f32 to vector<8x128xf32>
    %105 = arith.select %3, %103, %104 : vector<8x128xi1>, vector<8x128xf32>
    %106 = arith.maximumf %96, %102 : vector<8x128xf32>
    %107 = arith.maximumf %106, %105 : vector<8x128xf32>
    %108 = arith.subf %96, %107 : vector<8x128xf32>
    %109 = math.exp %108 : vector<8x128xf32>
    %110 = arith.subf %102, %107 : vector<8x128xf32>
    %111 = math.exp %110 : vector<8x128xf32>
    %112 = arith.addf %109, %111 : vector<8x128xf32>
    %113 = arith.subf %105, %107 : vector<8x128xf32>
    %114 = math.exp %113 : vector<8x128xf32>
    %115 = arith.addf %112, %114 : vector<8x128xf32>
    %116 = arith.addf %99, %107 : vector<8x128xf32>
    %117 = math.log %115 : vector<8x128xf32>
    %118 = arith.addf %116, %117 : vector<8x128xf32>
    %c4_i32 = arith.constant 4 : i32
    %119 = arith.index_cast %c4_i32 : i32 to index
    %c0_42 = arith.constant 0 : index
    %c0_43 = arith.constant 0 : index
    %120 = vector.load %arg6[%119, %c0_42, %c0_43] : memref<8x8x128xf32, #tpu.memory_space<vmem>>, vector<1x8x128xf32>
    %121 = vector.shape_cast %120 : vector<1x8x128xf32> to vector<8x128xf32>
    %c1_i32_44 = arith.constant 1 : i32
    %122 = tpu.dynamic_rotate %118 by %c1_i32_44 dim 1 : vector<8x128xf32>, i32 -> vector<8x128xf32>
    %cst_45 = arith.constant -1.000000e+30 : f32
    %123 = vector.broadcast %cst_45 : f32 to vector<8x128xf32>
    %124 = arith.select %39, %122, %123 : vector<8x128xi1>, vector<8x128xf32>
    %c2_i32_46 = arith.constant 2 : i32
    %125 = tpu.dynamic_rotate %118 by %c2_i32_46 dim 1 : vector<8x128xf32>, i32 -> vector<8x128xf32>
    %cst_47 = arith.constant -1.000000e+30 : f32
    %126 = vector.broadcast %cst_47 : f32 to vector<8x128xf32>
    %127 = arith.select %3, %125, %126 : vector<8x128xi1>, vector<8x128xf32>
    %128 = arith.maximumf %118, %124 : vector<8x128xf32>
    %129 = arith.maximumf %128, %127 : vector<8x128xf32>
    %130 = arith.subf %118, %129 : vector<8x128xf32>
    %131 = math.exp %130 : vector<8x128xf32>
    %132 = arith.subf %124, %129 : vector<8x128xf32>
    %133 = math.exp %132 : vector<8x128xf32>
    %134 = arith.addf %131, %133 : vector<8x128xf32>
    %135 = arith.subf %127, %129 : vector<8x128xf32>
    %136 = math.exp %135 : vector<8x128xf32>
    %137 = arith.addf %134, %136 : vector<8x128xf32>
    %138 = arith.addf %121, %129 : vector<8x128xf32>
    %139 = math.log %137 : vector<8x128xf32>
    %140 = arith.addf %138, %139 : vector<8x128xf32>
    %c5_i32 = arith.constant 5 : i32
    %141 = arith.index_cast %c5_i32 : i32 to index
    %c0_48 = arith.constant 0 : index
    %c0_49 = arith.constant 0 : index
    %142 = vector.load %arg6[%141, %c0_48, %c0_49] : memref<8x8x128xf32, #tpu.memory_space<vmem>>, vector<1x8x128xf32>
    %143 = vector.shape_cast %142 : vector<1x8x128xf32> to vector<8x128xf32>
    %c1_i32_50 = arith.constant 1 : i32
    %144 = tpu.dynamic_rotate %140 by %c1_i32_50 dim 1 : vector<8x128xf32>, i32 -> vector<8x128xf32>
    %cst_51 = arith.constant -1.000000e+30 : f32
    %145 = vector.broadcast %cst_51 : f32 to vector<8x128xf32>
    %146 = arith.select %39, %144, %145 : vector<8x128xi1>, vector<8x128xf32>
    %c2_i32_52 = arith.constant 2 : i32
    %147 = tpu.dynamic_rotate %140 by %c2_i32_52 dim 1 : vector<8x128xf32>, i32 -> vector<8x128xf32>
    %cst_53 = arith.constant -1.000000e+30 : f32
    %148 = vector.broadcast %cst_53 : f32 to vector<8x128xf32>
    %149 = arith.select %3, %147, %148 : vector<8x128xi1>, vector<8x128xf32>
    %150 = arith.maximumf %140, %146 : vector<8x128xf32>
    %151 = arith.maximumf %150, %149 : vector<8x128xf32>
    %152 = arith.subf %140, %151 : vector<8x128xf32>
    %153 = math.exp %152 : vector<8x128xf32>
    %154 = arith.subf %146, %151 : vector<8x128xf32>
    %155 = math.exp %154 : vector<8x128xf32>
    %156 = arith.addf %153, %155 : vector<8x128xf32>
    %157 = arith.subf %149, %151 : vector<8x128xf32>
    %158 = math.exp %157 : vector<8x128xf32>
    %159 = arith.addf %156, %158 : vector<8x128xf32>
    %160 = arith.addf %143, %151 : vector<8x128xf32>
    %161 = math.log %159 : vector<8x128xf32>
    %162 = arith.addf %160, %161 : vector<8x128xf32>
    %c6_i32 = arith.constant 6 : i32
    %163 = arith.index_cast %c6_i32 : i32 to index
    %c0_54 = arith.constant 0 : index
    %c0_55 = arith.constant 0 : index
    %164 = vector.load %arg6[%163, %c0_54, %c0_55] : memref<8x8x128xf32, #tpu.memory_space<vmem>>, vector<1x8x128xf32>
    %165 = vector.shape_cast %164 : vector<1x8x128xf32> to vector<8x128xf32>
    %c1_i32_56 = arith.constant 1 : i32
    %166 = tpu.dynamic_rotate %162 by %c1_i32_56 dim 1 : vector<8x128xf32>, i32 -> vector<8x128xf32>
    %cst_57 = arith.constant -1.000000e+30 : f32
    %167 = vector.broadcast %cst_57 : f32 to vector<8x128xf32>
    %168 = arith.select %39, %166, %167 : vector<8x128xi1>, vector<8x128xf32>
    %c2_i32_58 = arith.constant 2 : i32
    %169 = tpu.dynamic_rotate %162 by %c2_i32_58 dim 1 : vector<8x128xf32>, i32 -> vector<8x128xf32>
    %cst_59 = arith.constant -1.000000e+30 : f32
    %170 = vector.broadcast %cst_59 : f32 to vector<8x128xf32>
    %171 = arith.select %3, %169, %170 : vector<8x128xi1>, vector<8x128xf32>
    %172 = arith.maximumf %162, %168 : vector<8x128xf32>
    %173 = arith.maximumf %172, %171 : vector<8x128xf32>
    %174 = arith.subf %162, %173 : vector<8x128xf32>
    %175 = math.exp %174 : vector<8x128xf32>
    %176 = arith.subf %168, %173 : vector<8x128xf32>
    %177 = math.exp %176 : vector<8x128xf32>
    %178 = arith.addf %175, %177 : vector<8x128xf32>
    %179 = arith.subf %171, %173 : vector<8x128xf32>
    %180 = math.exp %179 : vector<8x128xf32>
    %181 = arith.addf %178, %180 : vector<8x128xf32>
    %182 = arith.addf %165, %173 : vector<8x128xf32>
    %183 = math.log %181 : vector<8x128xf32>
    %184 = arith.addf %182, %183 : vector<8x128xf32>
    %c7_i32 = arith.constant 7 : i32
    %185 = arith.index_cast %c7_i32 : i32 to index
    %c0_60 = arith.constant 0 : index
    %c0_61 = arith.constant 0 : index
    %186 = vector.load %arg6[%185, %c0_60, %c0_61] : memref<8x8x128xf32, #tpu.memory_space<vmem>>, vector<1x8x128xf32>
    %187 = vector.shape_cast %186 : vector<1x8x128xf32> to vector<8x128xf32>
    %c1_i32_62 = arith.constant 1 : i32
    %188 = tpu.dynamic_rotate %184 by %c1_i32_62 dim 1 : vector<8x128xf32>, i32 -> vector<8x128xf32>
    %cst_63 = arith.constant -1.000000e+30 : f32
    %189 = vector.broadcast %cst_63 : f32 to vector<8x128xf32>
    %190 = arith.select %39, %188, %189 : vector<8x128xi1>, vector<8x128xf32>
    %c2_i32_64 = arith.constant 2 : i32
    %191 = tpu.dynamic_rotate %184 by %c2_i32_64 dim 1 : vector<8x128xf32>, i32 -> vector<8x128xf32>
    %cst_65 = arith.constant -1.000000e+30 : f32
    %192 = vector.broadcast %cst_65 : f32 to vector<8x128xf32>
    %193 = arith.select %3, %191, %192 : vector<8x128xi1>, vector<8x128xf32>
    %194 = arith.maximumf %184, %190 : vector<8x128xf32>
    %195 = arith.maximumf %194, %193 : vector<8x128xf32>
    %196 = arith.subf %184, %195 : vector<8x128xf32>
    %197 = math.exp %196 : vector<8x128xf32>
    %198 = arith.subf %190, %195 : vector<8x128xf32>
    %199 = math.exp %198 : vector<8x128xf32>
    %200 = arith.addf %197, %199 : vector<8x128xf32>
    %201 = arith.subf %193, %195 : vector<8x128xf32>
    %202 = math.exp %201 : vector<8x128xf32>
    %203 = arith.addf %200, %202 : vector<8x128xf32>
    %204 = arith.addf %187, %195 : vector<8x128xf32>
    %205 = math.log %203 : vector<8x128xf32>
    %206 = arith.addf %204, %205 : vector<8x128xf32>
    %c7_i32_66 = arith.constant 7 : i32
    %c2_i32_67 = arith.constant 2 : i32
    %207 = vector.broadcast %c2_i32_67 : i32 to vector<8x1xi32>
    %208 = arith.muli %207, %4 : vector<8x1xi32>
    %209 = vector.broadcast %208 : vector<8x1xi32> to vector<8x128xi32>
    %210 = arith.cmpi eq, %11, %209 : vector<8x128xi32>
    %c1_i32_68 = arith.constant 1 : i32
    %211 = vector.broadcast %c1_i32_68 : i32 to vector<8x1xi32>
    %212 = arith.subi %208, %211 : vector<8x1xi32>
    %213 = vector.broadcast %212 : vector<8x1xi32> to vector<8x128xi32>
    %214 = arith.cmpi eq, %11, %213 : vector<8x128xi32>
    %c0_i32_69 = arith.constant 0 : i32
    %215 = vector.broadcast %c0_i32_69 : i32 to vector<8x1xi32>
    %216 = arith.cmpi sgt, %4, %215 : vector<8x1xi32>
    %217 = vector.broadcast %216 : vector<8x1xi1> to vector<8x128xi1>
    %218 = arith.andi %214, %217 : vector<8x128xi1>
    %219 = arith.ori %210, %218 : vector<8x128xi1>
    %cst_70 = arith.constant -1.000000e+30 : f32
    %220 = vector.broadcast %cst_70 : f32 to vector<8x128xf32>
    %221 = arith.select %219, %206, %220 : vector<8x128xi1>, vector<8x128xf32>
    %cst_71 = arith.constant dense<0xFF800000> : vector<8xf32>
    %222 = vector.multi_reduction <maximumf>, %221, %cst_71 [1] : vector<8x128xf32> to vector<8xf32>
    %223 = vector.shape_cast %222 : vector<8xf32> to vector<8x1xf32>
    %224 = vector.broadcast %223 : vector<8x1xf32> to vector<8x128xf32>
    %225 = arith.subf %221, %224 : vector<8x128xf32>
    %226 = math.exp %225 : vector<8x128xf32>
    %cst_72 = arith.constant dense<0.000000e+00> : vector<8xf32>
    %227 = vector.multi_reduction <add>, %226, %cst_72 [1] : vector<8x128xf32> to vector<8xf32>
    %228 = vector.shape_cast %227 : vector<8xf32> to vector<8x1xf32>
    %229 = math.log %228 : vector<8x1xf32>
    %230 = arith.addf %223, %229 : vector<8x1xf32>
    %cst_73 = arith.constant 0.000000e+00 : f32
    %231 = vector.broadcast %cst_73 : f32 to vector<8x1xf32>
    %232 = arith.subf %231, %230 : vector<8x1xf32>
    %cst_74 = arith.constant -1.000000e+29 : f32
    %233 = vector.broadcast %cst_74 : f32 to vector<8x1xf32>
    %234 = arith.cmpf olt, %230, %233 : vector<8x1xf32>
    %cst_75 = arith.constant 0.000000e+00 : f32
    %235 = vector.broadcast %cst_75 : f32 to vector<8x1xf32>
    %236 = arith.select %234, %235, %232 : vector<8x1xi1>, vector<8x1xf32>
    %237 = vector.shape_cast %236 : vector<8x1xf32> to vector<8x1xf32>
    %238 = vector.broadcast %237 : vector<8x1xf32> to vector<8x128xf32>
    %c0_76 = arith.constant 0 : index
    %c0_77 = arith.constant 0 : index
    %239 = vector.load %arg5[%c0_76, %c0_77] : memref<8x128xf32, #tpu.memory_space<vmem>>, vector<8x128xf32>
    tpu.vector_store %arg5[%c0_76, %c0_77], %238 {strides = array<i32>} : memref<8x128xf32, #tpu.memory_space<vmem>>, vector<8x128xf32>,
    return
  }
  func.func @transform_0(%arg0: i32) -> (i32, i32, i32) {
    %c0_i32 = arith.constant 0 : i32
    %c0_i32_0 = arith.constant 0 : i32
    %c0_i32_1 = arith.constant 0 : i32
    return %arg0, %c0_i32, %c0_i32_0 : i32, i32, i32
  }
  func.func @transform_1(%arg0: i32) -> (i32, i32) {
    %c0_i32 = arith.constant 0 : i32
    %c0_i32_0 = arith.constant 0 : i32
    return %arg0, %c0_i32 : i32, i32
  }
  func.func @transform_2(%arg0: i32) -> (i32, i32) {
    %c0_i32 = arith.constant 0 : i32
    %c0_i32_0 = arith.constant 0 : i32
    return %arg0, %c0_i32 : i32, i32
  }
  func.func @transform_3(%arg0: i32) -> (i32, i32) {
    %c0_i32 = arith.constant 0 : i32
    %c0_i32_0 = arith.constant 0 : i32
    return %arg0, %c0_i32 : i32, i32
  }
  func.func @transform_4(%arg0: i32) -> (i32, i32) {
    %c0_i32 = arith.constant 0 : i32
    %c0_i32_0 = arith.constant 0 : i32
    return %arg0, %c0_i32 : i32, i32
  }
}

</mosaic_0001>

<bundles_post_ra>
// kernel: tpu_custom_call.1
= control target key start
LH: loop header
LB: loop body
LE: loop exit
PB: predicated region body
PF: predicated region fallthrough
CT: control target
= control target key end

     0   :  { %9 = vsyncpa [#allocation4], 0  ;;  %s1566_s0 = inlined_call_operand.hbm [shape: f32[8,8,32], index: 0, kind: input, shape index: {}]   ;;  %s1567_s1 = inlined_call_operand.vmem [shape: s32[8,128], index: 1, kind: input, shape index: {}]   ;;  %s1568_s2 = inlined_call_operand.hbm [shape: s32[8,128], index: 2, kind: input, shape index: {}]   ;;  %s1569_s3 = inlined_call_operand.vmem [shape: s32[8,1], index: 3, kind: input, shape index: {}]   ;;  %s1570_s4 = inlined_call_operand.hbm [shape: f32[8,128], index: 4, kind: output, shape index: {}]  }
   0x1   :  { %10 = vsyncpa [#allocation7], 0 }
   0x2   :  { %11 = vsyncpa [#allocation5], 0  ;;  %s16_s17 = sshll.u32 %s1566_s0, 4  ;;  %s1129_s18 = smov [#allocation3]   ;;  %s17_s17 = int_to_ptr.hbm [resolvable:$true] %s16_s17 }
   0x3   :  { %s18_s19 = sshll.u32 %s1129_s18, 4  ;;  %s32_s22 = sshll.u32 %s1568_s2, 4  ;;  %s19_s19 = int_to_ptr.vmem [resolvable:$true] %s18_s19  ;;  %s33_s22 = int_to_ptr.hbm [resolvable:$true] %s32_s22 }
   0x4   :  { %s1130_s23 = smov 128   ;;  %s1131_s24 = smov 8  }
   0x5   :  { %24 = dma.hbm_to_vmem [thread:$0]  %s17_s17, 1024, %s19_s19, [#allocation4], %s1130_s23, %s1130_s23, %s1131_s24  }
   0x6   :  { %s1132_s25 = smov [#allocation6]  }
   0x7   :  { %s34_s26 = sshll.u32 %s1132_s25, 4  ;;  %s35_s26 = int_to_ptr.vmem [resolvable:$true] %s34_s26 }
   0x8   :  { %37 = dma.hbm_to_vmem [thread:$0]  %s33_s22, 128, %s35_s26, [#allocation7]  }
   0x9   :  { %1123 = dma.done.wait [#allocation4], 1024  }
   0xa   :  { %1124 = vsyncadd [#allocation4], 4294966272 }
   0xb   :  { %1125 = dma.done.wait [#allocation7], 128  }
   0xc   :  { %1126 = vsyncadd [#allocation7], 4294967168  ;;  %v52_v0 = vlaneseq  ;;  %vm184_vm0 = vcmask 261120   ;;  %v1174_v2 = vld [vmem:[#allocation3 + $0x38] sm:$0xff]  ;;  %v1176_v3 = vld [vmem:[#allocation3 + $0x28] sm:$0xff]  ;;  %v1133_v22 = vmov 1.0  }
   0xd   :  { %v1178_v4 = vld [vmem:[#allocation3 + $0x8] sm:$0xff]  ;;  %v206_v5 = vsel %vm184_vm0, %v1174_v2, -inf  ;;  %v200_v6 = vsel %vm184_vm0, %v1176_v3, -inf  ;;  %v1189_v8 = vld [vmem:[%s1567_s1] sm:$0xff]  ;;  %v1196_v12 = vld [vmem:[#allocation3 + $0x30] sm:$0xff]  ;;  %v1134_v40 = vmov 0  }
   0xe   :  { %v1172_v1 = vshrl.u32 %v52_v0, 7  ;;  %v188_v7 = vsel %vm184_vm0, %v1178_v4, -inf  ;;  %207 = vmax.xlane.f32.xlu0 %v206_v5  ;;  %201 = vmax.xlane.f32.xlu1 %v200_v6  ;;  %v59_v10 = vrot.slane %v1189_v8, 3  ;;  %v57_v11 = vrot.slane %v1189_v8, 1  ;;  %v1198_v13 = vld [vmem:[#allocation3 + $0x18] sm:$0xff]  ;;  %v1203_v15 = vld [vmem:[#allocation3 + $0x10] sm:$0xff] }
   0xf   :  { %189 = vmax.xlane.f32.xlu2 %v188_v7  ;;  %v203_v19 = vsel %vm184_vm0, %v1196_v12, -inf  ;;  %v194_v20 = vsel %vm184_vm0, %v1198_v13, -inf  ;;  %v191_v21 = vsel %vm184_vm0, %v1203_v15, -inf  ;;  %v1221_v23 = vld [vmem:[#allocation3 + $0x20] sm:$0xff]  ;;  %v58_v27 = vrot.slane %v1189_v8, 2  ;;  %956 = vset.pattern.permute.xlu0 %v1134_v40  ;;  %s1138_s28 = smov 1  }
  0x10   :  { %v1192_v9 = vadd.s32 24, %v1172_v1  ;;  %v1201_v14 = vadd.s32 16, %v1172_v1  ;;  %v67_v16 = vperm.slane %v59_v10, 0  ;;  %v65_v17 = vperm.slane %v57_v11, 0  ;;  %v1223_v24 = vld [vmem:[#allocation3] sm:$0xff]  ;;  %957 = vset.pattern.permute.xlu2 %v1134_v40  ;;  %958 = vset.pattern.permute.xlu1 %v1134_v40  ;;  %s1139_s29 = smov [#allocation8]  }
  0x11   :  { %v1206_v18 = vadd.s32 8, %v1172_v1  ;;  %v197_v25 = vsel %vm184_vm0, %v1221_v23, -inf  ;;  %v185_v26 = vsel %vm184_vm0, %v1223_v24, -inf  ;;  %v63_v28 = vrot.slane %v1189_v8, 7  ;;  %s859_s30 = sshll.u32 %s1139_s29, 4  ;;  %s861_s7 = sshll.u32 %s1570_s4, 4  ;;  %s860_s30 = int_to_ptr.vmem [resolvable:$true] %s859_s30  ;;  %s862_s7 = int_to_ptr.hbm [resolvable:$true] %s861_s7 }
  0x12   :  { %vm87_vm1 = vcmp.eq.s32.totalorder %v1192_v9, %v67_v16  ;;  %vm79_vm2 = vcmp.eq.s32.totalorder %v1192_v9, %v65_v17  ;;  %vm86_vm3 = vcmp.eq.s32.totalorder %v1201_v14, %v67_v16  ;;  %vm84_vm5 = vcmp.eq.s32.totalorder %v1172_v1, %v67_v16 }
  0x13   :  { %919 = vmatpush.msk.msra.mxu3 %vm87_vm1, %v1133_v22  ;;  %909 = vmatpush.msk.msra.mxu1 %vm79_vm2, %v1133_v22  ;;  %vm85_vm4 = vcmp.eq.s32.totalorder %v1206_v18, %v67_v16  ;;  %v66_v29 = vperm.slane %v58_v27, 0  ;;  %v71_v30 = vperm.slane %v63_v28, 0  ;;  %vm78_vm6 = vcmp.eq.s32.totalorder %v1201_v14, %v65_v17  ;;  %v51_v16 = vld [vmem:[%s1569_s3] sm:$0xff]  ;;  %s1137_s3 = smov 2  }
  0x14   :  { %vm77_vm9 = vcmp.eq.s32.totalorder %v1206_v18, %v65_v17  ;;  %v61_v31 = vrot.slane %v1189_v8, 5  ;;  %vm76_vm12 = vcmp.eq.s32.totalorder %v1172_v1, %v65_v17  ;;  %v62_v33 = vrot.slane %v1189_v8, 6 }
  0x15   :  { %920 = vmatpush.msk.msra.mxu3 %vm86_vm3, %v1133_v22  ;;  %vm83_vm7 = vcmp.eq.s32.totalorder %v1192_v9, %v66_v29  ;;  %vm103_vm8 = vcmp.eq.s32.totalorder %v1192_v9, %v71_v30  ;;  %910 = vmatpush.msk.msra.mxu1 %vm78_vm6, %v1133_v22  ;;  %vm82_vm10 = vcmp.eq.s32.totalorder %v1201_v14, %v66_v29  ;;  %v64_v35 = vperm.slane %v1189_v8, 0 }
  0x16   :  { %204 = vmax.xlane.f32.xlu1 %v203_v19  ;;  %195 = vmax.xlane.f32.xlu0 %v194_v20  ;;  %vm102_vm11 = vcmp.eq.s32.totalorder %v1201_v14, %v71_v30  ;;  %vm81_vm13 = vcmp.eq.s32.totalorder %v1206_v18, %v66_v29  ;;  %vm101_vm14 = vcmp.eq.s32.totalorder %v1206_v18, %v71_v30  ;;  %v69_v32 = vperm.slane %v61_v31, 0 }
  0x17   :  { %192 = vmax.xlane.f32.xlu2 %v191_v21  ;;  %921 = vmatpush.msk.msra.mxu3 %vm85_vm4, %v1133_v22  ;;  %vm80_vm15 = vcmp.eq.s32.totalorder %v1172_v1, %v66_v29  ;;  %vm100_vm2 = vcmp.eq.s32.totalorder %v1172_v1, %v71_v30  ;;  %v70_v34 = vperm.slane %v62_v33, 0  ;;  %v60_v36 = vrot.slane %v1189_v8, 4 }
  0x18   :  { %914 = vmatpush.msk.msra.mxu2 %vm83_vm7, %v1133_v22  ;;  %911 = vmatpush.msk.msra.mxu1 %vm77_vm9, %v1133_v22  ;;  %vm95_vm1 = vcmp.eq.s32.totalorder %v1192_v9, %v69_v32  ;;  %vm94_vm3 = vcmp.eq.s32.totalorder %v1201_v14, %v69_v32  ;;  %vm92_vm7 = vcmp.eq.s32.totalorder %v1172_v1, %v69_v32  ;;  %v1354_v17 = vmul.u32 2, %v51_v16 }
  0x19   :  { %922 = vmatpush.msk.msra.mxu3 %vm84_vm5, %v1133_v22  ;;  %vm99_vm4 = vcmp.eq.s32.totalorder %v1192_v9, %v70_v34  ;;  %vm93_vm5 = vcmp.eq.s32.totalorder %v1206_v18, %v69_v32  ;;  %vm98_vm6 = vcmp.eq.s32.totalorder %v1201_v14, %v70_v34  ;;  %vm96_vm9 = vcmp.eq.s32.totalorder %v1172_v1, %v70_v34 }
  0x1a   :  { %923 = vmatmul.msk.f32.vlgmr.msra.gmra.mxu3 %vm184_vm0, %v1198_v13  ;;  %915 = vmatpush.msk.msra.mxu2 %vm82_vm10, %v1133_v22  ;;  %vm75_vm10 = vcmp.eq.s32.totalorder %v1192_v9, %v64_v35  ;;  %v68_v37 = vperm.slane %v60_v36, 0 }
  0x1b   :  { %939 = vmatpush.msk.msrb.mxu3 %vm103_vm8, %v1133_v22  ;;  %912 = vmatpush.msk.msra.mxu1 %vm76_vm12, %v1133_v22  ;;  %vm97_vm8 = vcmp.eq.s32.totalorder %v1206_v18, %v70_v34  ;;  %vm73_vm12 = vcmp.eq.s32.totalorder %v1206_v18, %v64_v35 }
  0x1c   :  { %916 = vmatpush.msk.msra.mxu2 %vm81_vm13, %v1133_v22  ;;  %913 = vmatmul.msk.f32.vlgmr.msra.gmra.mxu1 %vm184_vm0, %v1178_v4  ;;  %vm72_vm13 = vcmp.eq.s32.totalorder %v1172_v1, %v64_v35 }
  0x1d   :  { %940 = vmatpush.msk.msrb.mxu3 %vm102_vm11, %v1133_v22  ;;  %929 = vmatpush.msk.msrb.mxu1 %vm95_vm1, %v1133_v22  ;;  %vm74_vm11 = vcmp.eq.s32.totalorder %v1201_v14, %v64_v35  ;;  %vm89_vm1 = vcmp.eq.s32.totalorder %v1206_v18, %v68_v37  ;;  %v171_v18 = vadd.s32 1, %v1354_v17 }
  0x1e   :  { %198 = vmax.xlane.f32.xlu0 %v197_v25  ;;  %186 = vmax.xlane.f32.xlu1 %v185_v26 }
  0x1f   :  { %941 = vmatpush.msk.msrb.mxu3 %vm101_vm14, %v1133_v22  ;;  %917 = vmatpush.msk.msra.mxu2 %vm80_vm15, %v1133_v22  ;;  %vm91_vm14 = vcmp.eq.s32.totalorder %v1192_v9, %v68_v37  ;;  %vm90_vm15 = vcmp.eq.s32.totalorder %v1201_v14, %v68_v37 }
  0x20   :  { %918 = vmatmul.msk.f32.vlgmr.msra.gmra.mxu2 %vm184_vm0, %v1203_v15  ;;  %930 = vmatpush.msk.msrb.mxu1 %vm94_vm3, %v1133_v22  ;;  %vm644_vm3 = vcmp.gt.s32.totalorder %v51_v16, 0 }
  0x21   :  { %942 = vmatpush.msk.msrb.mxu3 %vm100_vm2, %v1133_v22  ;;  %934 = vmatpush.msk.msrb.mxu2 %vm99_vm4, %v1133_v22  ;;  %vm88_vm2 = vcmp.eq.s32.totalorder %v1172_v1, %v68_v37  ;;  %v645_v19 = vsel %vm644_vm3, 1, %v1134_v40 }
  0x22   :  { %943 = vmatmul.msk.f32.vlgmr.msrb.gmra.mxu3 %vm184_vm0, %v1174_v2  ;;  %931 = vmatpush.msk.msrb.mxu1 %vm93_vm5, %v1133_v22 }
  0x23   :  { %935 = vmatpush.msk.msrb.mxu2 %vm98_vm6, %v1133_v22  ;;  %904 = vmatpush.msk.msra.mxu0 %vm75_vm10, %v1133_v22 }
  0x24   :  { %932 = vmatpush.msk.msrb.mxu1 %vm92_vm7, %v1133_v22 }
  0x25   :  { %936 = vmatpush.msk.msrb.mxu2 %vm97_vm8, %v1133_v22  ;;  %933 = vmatmul.msk.f32.vlgmr.msrb.gmra.mxu1 %vm184_vm0, %v1176_v3 }
  0x26   :  { %905 = vmatpush.msk.msra.mxu0 %vm74_vm11, %v1133_v22  ;;  %vm520_vm11 = vcmask 1047556  }
  0x27   :  { %937 = vmatpush.msk.msrb.mxu2 %vm96_vm9, %v1133_v22 }
  0x28   :  { %938 = vmatmul.msk.f32.vlgmr.msrb.gmra.mxu2 %vm184_vm0, %v1196_v12  ;;  %906 = vmatpush.msk.msra.mxu0 %vm73_vm12, %v1133_v22 }
  0x2a   :  { %907 = vmatpush.msk.msra.mxu0 %vm72_vm13, %v1133_v22 }
  0x2b   :  { %908 = vmatmul.msk.f32.vlgmr.msra.gmra.mxu0 %vm184_vm0, %v1223_v24 }
  0x2c   :  { %924 = vmatpush.msk.msrb.mxu0 %vm91_vm14, %v1133_v22 }
  0x2e   :  { %925 = vmatpush.msk.msrb.mxu0 %vm90_vm15, %v1133_v22 }
  0x30   :  { %926 = vmatpush.msk.msrb.mxu0 %vm89_vm1, %v1133_v22 }
  0x32   :  { %927 = vmatpush.msk.msrb.mxu0 %vm88_vm2, %v1133_v22 }
  0x33   :  { %928 = vmatmul.msk.f32.vlgmr.msrb.gmra.mxu0 %vm184_vm0, %v1221_v23 }
  0x81   :  { %v1306_v38 = vpop.xlane.xlu0 %207  ;;  %v1308_v39 = vpop.xlane.xlu1 %201 }
  0x82   :  { %v216_v41 = vsub.f32 %v1174_v2, %v1306_v38  ;;  %v214_v42 = vsub.f32 %v1176_v3, %v1308_v39  ;;  %v1317_v43 = vpop.xlane.xlu2 %189 }
  0x83   :  { %v210_v51 = vsub.f32 %v1178_v4, %v1317_v43 }
  0x84   :  { %v231_v44 = vmul.f32 1.442695, %v216_v41  ;;  %v227_v45 = vmul.f32 1.442695, %v214_v42 }
  0x85   :  { %v219_v60 = vmul.f32 1.442695, %v210_v51 }
  0x86   :  { %959 = vpow2.f32 %v231_v44 }
  0x87   :  { %961 = vpow2.f32 %v227_v45 }
  0x89   :  { %v1321_v46 = vpop.xlane.xlu1 %204  ;;  %v1323_v47 = vpop.xlane.xlu0 %195 }
  0x8a   :  { %v215_v48 = vsub.f32 %v1196_v12, %v1321_v46  ;;  %v212_v49 = vsub.f32 %v1198_v13, %v1323_v47  ;;  %v1329_v50 = vpop.xlane.xlu2 %192 }
  0x8b   :  { %v211_v52 = vsub.f32 %v1203_v15, %v1329_v50 }
  0x8c   :  { %v960_v53 = vpop.eup %959  ;;  %v229_v54 = vmul.f32 1.442695, %v215_v48  ;;  %v223_v55 = vmul.f32 1.442695, %v212_v49 }
  0x8d   :  { %v962_v56 = vpop.eup %961  ;;  %v221_v57 = vmul.f32 1.442695, %v211_v52  ;;  %v254_v58 = vsel %vm184_vm0, %v960_v53, 0.0 }
  0x8e   :  { %963 = vpow2.f32 %v229_v54  ;;  %255 = vadd.xlane.f32.xlu2 %v254_v58  ;;  %v248_v59 = vsel %vm184_vm0, %v962_v56, 0.0 }
  0x8f   :  { %965 = vpow2.f32 %v223_v55  ;;  %249 = vadd.xlane.f32.xlu1 %v248_v59 }
  0x90   :  { %967 = vpow2.f32 %v221_v57  ;;  %v1135_v57 = vmov 1983009808  }
  0x91   :  { %v1337_v61 = vpop.xlane.xlu0 %198  ;;  %v1339_v62 = vpop.xlane.xlu1 %186  ;;  %969 = vpow2.f32 %v219_v60  ;;  %v525_v58 = vunpack.c.l.s4 %v1135_v57 }
  0x92   :  { %v213_v63 = vsub.f32 %v1221_v23, %v1337_v61  ;;  %v209_v1 = vsub.f32 %v1223_v24, %v1339_v62 }
  0x94   :  { %v964_v2 = vpop.eup %963  ;;  %v225_v3 = vmul.f32 1.442695, %v213_v63  ;;  %v217_v4 = vmul.f32 1.442695, %v209_v1  ;;  %v1388_v1 = vand.u32 127, %v52_v0 }
  0x95   :  { %v966_v5 = vpop.eup %965  ;;  %v251_v6 = vsel %vm184_vm0, %v964_v2, 0.0 }
  0x96   :  { %v968_v7 = vpop.eup %967  ;;  %971 = vpow2.f32 %v225_v3  ;;  %v242_v8 = vsel %vm184_vm0, %v966_v5, 0.0  ;;  %252 = vadd.xlane.f32.xlu2 %v251_v6  ;;  %v1401_v5 = vunpack.c.0.s8 %v525_v58 }
  0x97   :  { %973 = vpow2.f32 %v217_v4  ;;  %243 = vadd.xlane.f32.xlu0 %v242_v8  ;;  %v239_v9 = vsel %vm184_vm0, %v968_v7, 0.0  ;;  %v970_v10 = vpop.eup %969  ;;  %v1136_v7 = vmov 1934713408  }
  0x98   :  { %240 = vadd.xlane.f32.xlu1 %v239_v9  ;;  %v236_v12 = vsel %vm184_vm0, %v970_v10, 0.0  ;;  %v573_v8 = vunpack.c.l.s4 %v1136_v7 }
  0x99   :  { %v1358_v28 = vpop.f32.mrf.mxu1 }
  0x9c   :  { %v972_v11 = vpop.eup %971 }
  0x9d   :  { %v974_v13 = vpop.eup %973  ;;  %v245_v14 = vsel %vm184_vm0, %v972_v11, 0.0  ;;  %v1360_v31 = vpop.f32.mrf.mxu3 }
  0x9e   :  { %246 = vadd.xlane.f32.xlu2 %v245_v14  ;;  %v233_v15 = vsel %vm184_vm0, %v974_v13, 0.0 }
  0x9f   :  { %237 = vadd.xlane.f32.xlu0 %v236_v12 }
  0xa0   :  { %234 = vadd.xlane.f32.xlu1 %v233_v15 }
  0xa2   :  { %v1369_v54 = vpop.f32.mrf.mxu1 }
  0xa3   :  { %v1362_v32 = vpop.f32.mrf.mxu2 }
  0xa5   :  { %v1383_v63 = vpop.f32.mrf.mxu3 }
  0xa8   :  { %v1364_v35 = vpop.f32.mrf.mxu0 }
  0xb0   :  { %v1393_v3 = vpop.f32.mrf.mxu0 }
  0xb3   :  { %173 = vperm.xlu0 %956, %v171_v18  }
  0xb6   :  { %647 = vperm.xlu2 %957, %v645_v19  }
 0x101   :  { %v256_v20 = vpop.xlane.xlu2 %255 }
 0x102   :  { %v250_v21 = vpop.xlane.xlu1 %249  ;;  %975 = vlog2.f32 %v256_v20 }
 0x103   :  { %977 = vlog2.f32 %v250_v21 }
 0x108   :  { %v976_v27 = vpop.eup %975 }
 0x109   :  { %v253_v22 = vpop.xlane.xlu2 %252  ;;  %v978_v30 = vpop.eup %977  ;;  %v272_v41 = vmul.f32 0.6931472, %v976_v27 }
 0x10a   :  { %v244_v23 = vpop.xlane.xlu0 %243  ;;  %979 = vlog2.f32 %v253_v22  ;;  %v268_v42 = vmul.f32 0.6931472, %v978_v30 }
 0x10b   :  { %v241_v24 = vpop.xlane.xlu1 %240  ;;  %981 = vlog2.f32 %v244_v23  ;;  %v1372_v55 = vadd.f32 %v272_v41, %v1306_v38 }
 0x10c   :  { %983 = vlog2.f32 %v241_v24  ;;  %v1367_v53 = vadd.f32 %v268_v42, %v1308_v39  ;;  %v1385_v39 = vpop.f32.mrf.mxu2 }
 0x110   :  { %v980_v33 = vpop.eup %979 }
 0x111   :  { %v247_v25 = vpop.xlane.xlu2 %246  ;;  %v982_v34 = vpop.eup %981  ;;  %v270_v44 = vmul.f32 0.6931472, %v980_v33 }
 0x112   :  { %v238_v26 = vpop.xlane.xlu0 %237  ;;  %985 = vlog2.f32 %v247_v25  ;;  %v984_v36 = vpop.eup %983  ;;  %v264_v45 = vmul.f32 0.6931472, %v982_v34 }
 0x113   :  { %v235_v29 = vpop.xlane.xlu1 %234  ;;  %987 = vlog2.f32 %v238_v26  ;;  %v262_v48 = vmul.f32 0.6931472, %v984_v36  ;;  %v1375_v56 = vadd.f32 %v270_v44, %v1321_v46 }
 0x114   :  { %989 = vlog2.f32 %v235_v29  ;;  %v1378_v59 = vadd.f32 %v264_v45, %v1323_v47  ;;  %v470_v47 = vsub.f32 %v1369_v54, %v1367_v53 }
 0x115   :  { %v1381_v60 = vadd.f32 %v262_v48, %v1329_v50  ;;  %v472_v50 = vsub.f32 %v1383_v63, %v1372_v55  ;;  %v471_v4 = vsub.f32 %v1385_v39, %v1375_v56 }
 0x116   :  { %v468_v6 = vsub.f32 %v1360_v31, %v1378_v59  ;;  %v1445_v59 = vunpack.c.0.s8 %v573_v8 }
 0x118   :  { %v986_v37 = vpop.eup %985 }
 0x119   :  { %v988_v49 = vpop.eup %987  ;;  %v266_v51 = vmul.f32 0.6931472, %v986_v37  ;;  %v1420_v34 = vpop.permute.xlu2 %647 }
 0x11a   :  { %v990_v52 = vpop.eup %989  ;;  %v260_v38 = vmul.f32 0.6931472, %v988_v49 }
 0x11b   :  { %v258_v2 = vmul.f32 0.6931472, %v990_v52  ;;  %v1391_v46 = vadd.f32 %v266_v51, %v1337_v61  ;;  %v467_v61 = vsub.f32 %v1362_v32, %v1381_v60 }
 0x11c   :  { %v274_v9 = vadd.f32 %v260_v38, %v1317_v43 }
 0x11d   :  { %v273_v10 = vadd.f32 %v258_v2, %v1339_v62  ;;  %v469_v11 = vsub.f32 %v1393_v3, %v1391_v46 }
 0x11e   :  { %v466_v36 = vsub.f32 %v1358_v28, %v274_v9 }
 0x11f   :  { %v465_v45 = vsub.f32 %v1364_v35, %v273_v10 }
 0x125   :  { %v174_v0 = vpop.permute.xlu0 %173 }
 0x126   :  { %vm175_vm0 = vcmp.lt.s32.totalorder %v1388_v1, %v174_v0 }
 0x127   :  { %v473_v12 = vsel %vm175_vm0, 1, %v1134_v40 }
 0x128   :  { %v474_v13 = vrot.slane %v473_v12, 1  ;;  %v475_v14 = vrot.slane %v473_v12, 2  ;;  %v476_v15 = vrot.slane %v473_v12, 3  ;;  %v477_v16 = vrot.slane %v473_v12, 4 }
 0x129   :  { %v478_v18 = vrot.slane %v473_v12, 5  ;;  %v479_v19 = vrot.slane %v473_v12, 6  ;;  %v480_v20 = vrot.slane %v473_v12, 7  ;;  %v495_v21 = vperm.slane %v473_v12, 0 }
 0x12a   :  { %vm481_vm4 = vcmp.ne.s32.totalorder %v474_v13, 0  ;;  %vm482_vm5 = vcmp.ne.s32.totalorder %v475_v14, 0  ;;  %vm483_vm6 = vcmp.ne.s32.totalorder %v476_v15, 0  ;;  %vm484_vm7 = vcmp.ne.s32.totalorder %v477_v16, 0 }
 0x12b   :  { %vm485_vm8 = vcmp.ne.s32.totalorder %v478_v18, 0  ;;  %vm486_vm9 = vcmp.ne.s32.totalorder %v479_v19, 0  ;;  %vm487_vm10 = vcmp.ne.s32.totalorder %v480_v20, 0  ;;  %v488_v43 = vsel %vm481_vm4, 1, %v1134_v40 }
 0x12c   :  { %v489_v62 = vsel %vm482_vm5, 1, %v1134_v40  ;;  %v490_v22 = vsel %vm483_vm6, 1, %v1134_v40  ;;  %v491_v23 = vsel %vm484_vm7, 1, %v1134_v40  ;;  %v492_v24 = vsel %vm485_vm8, 1, %v1134_v40 }
 0x12d   :  { %v493_v25 = vsel %vm486_vm9, 1, %v1134_v40  ;;  %v494_v26 = vsel %vm487_vm10, 1, %v1134_v40  ;;  %v496_v27 = vperm.slane %v488_v43, 0  ;;  %v497_v29 = vperm.slane %v489_v62, 0 }
 0x12e   :  { %v498_v30 = vperm.slane %v490_v22, 0  ;;  %v499_v31 = vperm.slane %v491_v23, 0  ;;  %v500_v32 = vperm.slane %v492_v24, 0  ;;  %v501_v33 = vperm.slane %v493_v25, 0 }
 0x12f   :  { %v502_v37 = vperm.slane %v494_v26, 0  ;;  %vm1423_vm12 = vcmp.eq.s32.totalorder %v495_v21, 1  ;;  %vm505_vm13 = vcmp.eq.s32.totalorder %v497_v29, 1  ;;  %vm1427_vm14 = vcmp.eq.s32.totalorder %v496_v27, 1 }
 0x130   :  { %vm506_vm15 = vcmp.eq.s32.totalorder %v498_v30, 1  ;;  %vm508_vm1 = vcmp.eq.s32.totalorder %v500_v32, 1  ;;  %vm509_vm2 = vcmp.eq.s32.totalorder %v501_v33, 1  ;;  %vm1431_vm3 = vcmp.eq.s32.totalorder %v499_v31, 1 }
 0x131   :  { %vm510_vm0 = vcmp.eq.s32.totalorder %v502_v37, 1  ;;  %v513_v44 = vsel %vm505_vm13, %v467_v61, -1e+30  ;;  %v514_v28 = vsel %vm506_vm15, %v468_v6, -1e+30  ;;  %vm643_vm4 = vcmp.eq.s32.totalorder %v1388_v1, 1 }
 0x132   :  { %vm649_vm5 = vcmp.eq.s32.totalorder %v1420_v34, 1  ;;  %v516_v48 = vsel %vm508_vm1, %v470_v47, -1e+30  ;;  %v517_v49 = vsel %vm509_vm2, %v471_v4, -1e+30  ;;  %v532_v52 = vrot.slane %v514_v28, 4 }
 0x133   :  { %v518_v51 = vsel %vm510_vm0, %v472_v50, -1e+30  ;;  %v544_v53 = vrot.slane %v517_v49, 4  ;;  %v558_v55 = vrot.slane %v516_v48, 4  ;;  %vm642_vm6 = vcmp.eq.s32.totalorder %v1388_v1, 0  ;;  %vm650_vm7 = vmand %vm643_vm4, %vm649_vm5 }
 0x134   :  { %v556_v54 = vrot.slane %v518_v51, 4  ;;  %v511_v56 = vsel %vm1423_vm12, %v465_v45, -1e+30  ;;  %v512_v57 = vsel %vm1427_vm14, %v466_v36, -1e+30  ;;  %v519_v60 = vrot.slane %v513_v44, 4  ;;  %vm651_vm8 = vmor %vm642_vm6, %vm650_vm7 }
 0x135   :  { %v515_v58 = vsel %vm1431_vm3, %v469_v11, -1e+30  ;;  %v559_v35 = vsel %vm520_vm11, %v518_v51, %v558_v55  ;;  %v522_v63 = vrot.slane %v511_v56, 4  ;;  %v533_v39 = vsel %vm520_vm11, %v532_v52, %v512_v57 }
 0x136   :  { %v567_v38 = vperm.slane %v559_v35, %v1401_v5  ;;  %v534_v2 = vrot.slane %v512_v57, 4  ;;  %v539_v46 = vperm.slane %v533_v39, %v1401_v5  ;;  %v545_v3 = vsel %vm520_vm11, %v544_v53, %v515_v58 }
 0x137   :  { %v521_v47 = vsel %vm520_vm11, %v519_v60, %v511_v56  ;;  %v546_v50 = vrot.slane %v515_v58, 4  ;;  %v551_v4 = vperm.slane %v545_v3, %v1401_v5  ;;  %v557_v0 = vsel %vm520_vm11, %v556_v54, %v516_v48  ;;  %v1507_v60 = vld [vmem:[#allocation6] sm:$0xff] }
 0x138   :  { %v527_v6 = vperm.slane %v521_v47, %v1401_v5  ;;  %v563_v61 = vperm.slane %v557_v0, %v1401_v5  ;;  %v568_v7 = vrot.slane %v539_v46, 4  ;;  %v523_v8 = vsel %vm520_vm11, %v513_v44, %v522_v63 }
 0x139   :  { %v594_v9 = vrot.slane %v551_v4, 4  ;;  %v531_v10 = vperm.slane %v523_v8, %v1401_v5  ;;  %v535_v11 = vsel %vm520_vm11, %v514_v28, %v534_v2  ;;  %v547_v12 = vsel %vm520_vm11, %v517_v49, %v546_v50 }
 0x13a   :  { %v569_v13 = vsel %vm520_vm11, %v568_v7, %v527_v6  ;;  %v570_v14 = vrot.slane %v527_v6, 4  ;;  %v592_v15 = vrot.slane %v563_v61, 4  ;;  %v543_v16 = vperm.slane %v535_v11, %v1401_v5 }
 0x13b   :  { %v575_v18 = vperm.slane %v569_v13, %v1445_v59  ;;  %v595_v19 = vsel %vm520_vm11, %v563_v61, %v594_v9  ;;  %v555_v20 = vperm.slane %v547_v12, %v1401_v5  ;;  %v604_v21 = vrot.slane %v567_v38, 4 }
 0x13c   :  { %v593_v43 = vsel %vm520_vm11, %v592_v15, %v551_v4  ;;  %v571_v62 = vsel %vm520_vm11, %v539_v46, %v570_v14  ;;  %v603_v22 = vperm.slane %v595_v19, %v1445_v59  ;;  %v580_v23 = vrot.slane %v543_v16, 4 }
 0x13d   :  { %v599_v24 = vperm.slane %v593_v43, %v1445_v59  ;;  %v618_v25 = vrot.slane %v575_v18, 4  ;;  %v579_v26 = vperm.slane %v571_v62, %v1445_v59  ;;  %v605_v5 = vsel %vm520_vm11, %v604_v21, %v555_v20 }
 0x13e   :  { %v620_v27 = vrot.slane %v603_v22, 4  ;;  %v581_v29 = vsel %vm520_vm11, %v580_v23, %v531_v10  ;;  %v611_v30 = vperm.slane %v605_v5, %v1445_v59  ;;  %v582_v31 = vrot.slane %v531_v10, 4 }
 0x13f   :  { %v616_v32 = vrot.slane %v599_v24, 4  ;;  %v619_v33 = vsel %vm520_vm11, %v599_v24, %v618_v25  ;;  %v622_v36 = vrot.slane %v579_v26, 4  ;;  %v587_v37 = vperm.slane %v581_v29, %v1445_v59 }
 0x140   :  { %v1483_v41 = vsel %vm520_vm11, %v620_v27, %v579_v26  ;;  %v624_v42 = vrot.slane %v611_v30, 4  ;;  %v583_v40 = vsel %vm520_vm11, %v543_v16, %v582_v31  ;;  %v606_v44 = vrot.slane %v555_v20, 4 }
 0x141   :  { %v617_v28 = vsel %vm520_vm11, %v616_v32, %v575_v18  ;;  %v1488_v45 = vsel %vm520_vm11, %v603_v22, %v622_v36  ;;  %v626_v48 = vrot.slane %v587_v37, 4  ;;  %v591_v49 = vperm.slane %v583_v40, %v1445_v59 }
 0x142   :  { %v652_v51 = vsel %vm651_vm8, %v617_v28, -1e+30  ;;  %v1492_v52 = vsel %vm520_vm11, %v624_v42, %v587_v37  ;;  %v607_v53 = vsel %vm520_vm11, %v567_v38, %v606_v44  ;;  %vm640_vm9 = vcmp.ge.s32.totalorder %v1388_v1, 1 }
 0x143   :  { %658 = vrot.lane.b32.xlu2 %v652_v51, %s1137_s3  ;;  %655 = vrot.lane.b32.xlu1 %v652_v51, %s1138_s28  ;;  %v1498_v54 = vsel %vm520_vm11, %v611_v30, %v626_v48  ;;  %v615_v55 = vperm.slane %v607_v53, %v1445_v59  ;;  %v630_v56 = vrot.slane %v591_v49, 4  ;;  %vm50_vm10 = vcmp.gt.s32.totalorder %v1507_v60, 0 }
 0x145   :  { %v628_v57 = vrot.slane %v615_v55, 4  ;;  %v1502_v58 = vsel %vm520_vm11, %v615_v55, %v630_v56 }
 0x147   :  { %v1505_v35 = vsel %vm520_vm11, %v628_v57, %v591_v49 }
 0x19d   :  { %v659_v63 = vpop.permute.xlu2 %658 }
 0x19e   :  { %v660_v2 = vsel %vm50_vm10, %v659_v63, -1e+30 }
 0x1b5   :  { %v656_v39 = vpop.permute.xlu1 %655 }
 0x1b6   :  { %v657_v38 = vsel %vm640_vm9, %v656_v39, -1e+30 }
 0x1b7   :  { %v661_v59 = vmax.f32 %v652_v51, %v657_v38 }
 0x1b9   :  { %v662_v46 = vmax.f32 %v661_v59, %v660_v2 }
 0x1bb   :  { %v663_v3 = vsub.f32 %v652_v51, %v662_v46  ;;  %v666_v47 = vsub.f32 %v657_v38, %v662_v46  ;;  %v670_v50 = vsub.f32 %v660_v2, %v662_v46  ;;  %v674_v12 = vadd.f32 %v662_v46, %v619_v33 }
 0x1bd   :  { %v664_v4 = vmul.f32 1.442695, %v663_v3  ;;  %v667_v0 = vmul.f32 1.442695, %v666_v47  ;;  %v671_v6 = vmul.f32 1.442695, %v670_v50 }
 0x1bf   :  { %991 = vpow2.f32 %v664_v4 }
 0x1c0   :  { %993 = vpow2.f32 %v667_v0 }
 0x1c1   :  { %995 = vpow2.f32 %v671_v6 }
 0x1c5   :  { %v992_v61 = vpop.eup %991 }
 0x1c6   :  { %v994_v7 = vpop.eup %993 }
 0x1c7   :  { %v669_v8 = vadd.f32 %v994_v7, %v992_v61  ;;  %v996_v9 = vpop.eup %995 }
 0x1c9   :  { %v673_v10 = vadd.f32 %v996_v9, %v669_v8 }
 0x1cb   :  { %997 = vlog2.f32 %v673_v10 }
 0x1d1   :  { %v998_v11 = vpop.eup %997 }
 0x1d2   :  { %v676_v13 = vmul.f32 0.6931472, %v998_v11 }
 0x1d4   :  { %v677_v14 = vadd.f32 %v676_v13, %v674_v12 }
 0x1d6   :  { %683 = vrot.lane.b32.xlu1 %v677_v14, %s1137_s3  ;;  %680 = vrot.lane.b32.xlu2 %v677_v14, %s1138_s28 }
 0x230   :  { %v681_v15 = vpop.permute.xlu2 %680 }
 0x231   :  { %v682_v16 = vsel %vm640_vm9, %v681_v15, -1e+30 }
 0x232   :  { %v686_v18 = vmax.f32 %v677_v14, %v682_v16 }
 0x248   :  { %v684_v19 = vpop.permute.xlu1 %683 }
 0x249   :  { %v685_v20 = vsel %vm50_vm10, %v684_v19, -1e+30 }
 0x24a   :  { %v687_v21 = vmax.f32 %v686_v18, %v685_v20 }
 0x24c   :  { %v688_v43 = vsub.f32 %v677_v14, %v687_v21  ;;  %v691_v62 = vsub.f32 %v682_v16, %v687_v21  ;;  %v695_v22 = vsub.f32 %v685_v20, %v687_v21  ;;  %v699_v32 = vadd.f32 %v687_v21, %v1483_v41 }
 0x24e   :  { %v689_v23 = vmul.f32 1.442695, %v688_v43  ;;  %v692_v24 = vmul.f32 1.442695, %v691_v62  ;;  %v696_v25 = vmul.f32 1.442695, %v695_v22 }
 0x250   :  { %999 = vpow2.f32 %v689_v23 }
 0x251   :  { %1001 = vpow2.f32 %v692_v24 }
 0x252   :  { %1003 = vpow2.f32 %v696_v25 }
 0x256   :  { %v1000_v26 = vpop.eup %999 }
 0x257   :  { %v1002_v5 = vpop.eup %1001 }
 0x258   :  { %v694_v27 = vadd.f32 %v1002_v5, %v1000_v26  ;;  %v1004_v29 = vpop.eup %1003 }
 0x25a   :  { %v698_v30 = vadd.f32 %v1004_v29, %v694_v27 }
 0x25c   :  { %1005 = vlog2.f32 %v698_v30 }
 0x262   :  { %v1006_v31 = vpop.eup %1005 }
 0x263   :  { %v701_v33 = vmul.f32 0.6931472, %v1006_v31 }
 0x265   :  { %v702_v36 = vadd.f32 %v701_v33, %v699_v32 }
 0x267   :  { %708 = vrot.lane.b32.xlu2 %v702_v36, %s1137_s3  ;;  %705 = vrot.lane.b32.xlu0 %v702_v36, %s1138_s28 }
 0x2c1   :  { %v709_v37 = vpop.permute.xlu2 %708 }
 0x2c2   :  { %v710_v28 = vsel %vm50_vm10, %v709_v37, -1e+30 }
 0x2d9   :  { %v706_v42 = vpop.permute.xlu0 %705 }
 0x2da   :  { %v707_v40 = vsel %vm640_vm9, %v706_v42, -1e+30 }
 0x2db   :  { %v711_v44 = vmax.f32 %v702_v36, %v707_v40 }
 0x2dd   :  { %v712_v48 = vmax.f32 %v711_v44, %v710_v28 }
 0x2df   :  { %v713_v49 = vsub.f32 %v702_v36, %v712_v48  ;;  %v716_v51 = vsub.f32 %v707_v40, %v712_v48  ;;  %v720_v53 = vsub.f32 %v710_v28, %v712_v48  ;;  %v724_v46 = vadd.f32 %v712_v48, %v1488_v45 }
 0x2e1   :  { %v714_v41 = vmul.f32 1.442695, %v713_v49  ;;  %v717_v55 = vmul.f32 1.442695, %v716_v51  ;;  %v721_v56 = vmul.f32 1.442695, %v720_v53 }
 0x2e2   :  { %v944_v49 = vadd.s32 4294967295, %v1354_v17 }
 0x2e3   :  { %1007 = vpow2.f32 %v714_v41 }
 0x2e4   :  { %1009 = vpow2.f32 %v717_v55 }
 0x2e5   :  { %1011 = vpow2.f32 %v721_v56 }
 0x2e9   :  { %v1008_v57 = vpop.eup %1007 }
 0x2ea   :  { %v1010_v63 = vpop.eup %1009 }
 0x2eb   :  { %v719_v39 = vadd.f32 %v1010_v63, %v1008_v57  ;;  %v1012_v38 = vpop.eup %1011 }
 0x2ed   :  { %v723_v59 = vadd.f32 %v1012_v38, %v719_v39 }
 0x2ef   :  { %1013 = vlog2.f32 %v723_v59 }
 0x2f5   :  { %v1014_v2 = vpop.eup %1013 }
 0x2f6   :  { %v726_v3 = vmul.f32 0.6931472, %v1014_v2 }
 0x2f8   :  { %v727_v47 = vadd.f32 %v726_v3, %v724_v46 }
 0x2fa   :  { %733 = vrot.lane.b32.xlu0 %v727_v47, %s1137_s3  ;;  %730 = vrot.lane.b32.xlu1 %v727_v47, %s1138_s28 }
 0x36c   :  { %v734_v50 = vpop.permute.xlu0 %733  ;;  %v731_v4 = vpop.permute.xlu1 %730 }
 0x36d   :  { %v732_v0 = vsel %vm640_vm9, %v731_v4, -1e+30  ;;  %v735_v61 = vsel %vm50_vm10, %v734_v50, -1e+30 }
 0x36e   :  { %v736_v6 = vmax.f32 %v727_v47, %v732_v0 }
 0x370   :  { %v737_v7 = vmax.f32 %v736_v6, %v735_v61 }
 0x372   :  { %v738_v8 = vsub.f32 %v727_v47, %v737_v7  ;;  %v741_v9 = vsub.f32 %v732_v0, %v737_v7  ;;  %v745_v10 = vsub.f32 %v735_v61, %v737_v7  ;;  %v749_v20 = vadd.f32 %v737_v7, %v1492_v52 }
 0x374   :  { %v739_v45 = vmul.f32 1.442695, %v738_v8  ;;  %v742_v11 = vmul.f32 1.442695, %v741_v9  ;;  %v746_v12 = vmul.f32 1.442695, %v745_v10 }
 0x376   :  { %1015 = vpow2.f32 %v739_v45 }
 0x377   :  { %1017 = vpow2.f32 %v742_v11 }
 0x378   :  { %1019 = vpow2.f32 %v746_v12 }
 0x37c   :  { %v1016_v13 = vpop.eup %1015 }
 0x37d   :  { %v1018_v14 = vpop.eup %1017 }
 0x37e   :  { %v744_v15 = vadd.f32 %v1018_v14, %v1016_v13  ;;  %v1020_v16 = vpop.eup %1019 }
 0x380   :  { %v748_v18 = vadd.f32 %v1020_v16, %v744_v15 }
 0x382   :  { %1021 = vlog2.f32 %v748_v18 }
 0x388   :  { %v1022_v19 = vpop.eup %1021 }
 0x389   :  { %v751_v21 = vmul.f32 0.6931472, %v1022_v19 }
 0x38b   :  { %v752_v43 = vadd.f32 %v751_v21, %v749_v20 }
 0x38d   :  { %758 = vrot.lane.b32.xlu1 %v752_v43, %s1137_s3  ;;  %755 = vrot.lane.b32.xlu2 %v752_v43, %s1138_s28 }
 0x3e7   :  { %v756_v62 = vpop.permute.xlu2 %755 }
 0x3e8   :  { %v757_v22 = vsel %vm640_vm9, %v756_v62, -1e+30 }
 0x3e9   :  { %v761_v23 = vmax.f32 %v752_v43, %v757_v22 }
 0x3ff   :  { %v759_v24 = vpop.permute.xlu1 %758 }
 0x400   :  { %v760_v25 = vsel %vm50_vm10, %v759_v24, -1e+30 }
 0x401   :  { %v762_v26 = vmax.f32 %v761_v23, %v760_v25 }
 0x403   :  { %v763_v5 = vsub.f32 %v752_v43, %v762_v26  ;;  %v766_v27 = vsub.f32 %v757_v22, %v762_v26  ;;  %v770_v29 = vsub.f32 %v760_v25, %v762_v26  ;;  %v774_v44 = vadd.f32 %v762_v26, %v1498_v54 }
 0x405   :  { %v764_v52 = vmul.f32 1.442695, %v763_v5  ;;  %v767_v30 = vmul.f32 1.442695, %v766_v27  ;;  %v771_v31 = vmul.f32 1.442695, %v770_v29 }
 0x407   :  { %1023 = vpow2.f32 %v764_v52 }
 0x408   :  { %1025 = vpow2.f32 %v767_v30 }
 0x409   :  { %1027 = vpow2.f32 %v771_v31 }
 0x40d   :  { %v1024_v32 = vpop.eup %1023 }
 0x40e   :  { %v1026_v33 = vpop.eup %1025 }
 0x40f   :  { %v769_v36 = vadd.f32 %v1026_v33, %v1024_v32  ;;  %v1028_v37 = vpop.eup %1027 }
 0x411   :  { %v773_v42 = vadd.f32 %v1028_v37, %v769_v36 }
 0x413   :  { %1029 = vlog2.f32 %v773_v42 }
 0x419   :  { %v1030_v40 = vpop.eup %1029 }
 0x41a   :  { %v776_v28 = vmul.f32 0.6931472, %v1030_v40 }
 0x41c   :  { %v777_v48 = vadd.f32 %v776_v28, %v774_v44 }
 0x41e   :  { %783 = vrot.lane.b32.xlu2 %v777_v48, %s1137_s3  ;;  %780 = vrot.lane.b32.xlu0 %v777_v48, %s1138_s28 }
 0x426   :  { %834 = vperm.xlu2 %957, %v944_v49  }
 0x478   :  { %v784_v51 = vpop.permute.xlu2 %783 }
 0x479   :  { %v785_v56 = vsel %vm50_vm10, %v784_v51, -1e+30 }
 0x480   :  { %v835_v62 = vpop.permute.xlu2 %834 }
 0x481   :  { %vm836_vm11 = vcmp.eq.s32.totalorder %v1388_v1, %v835_v62 }
 0x482   :  { %vm837_vm13 = vmand %vm836_vm11, %vm649_vm5 }
 0x490   :  { %v781_v53 = vpop.permute.xlu0 %780 }
 0x491   :  { %v782_v41 = vsel %vm640_vm9, %v781_v53, -1e+30 }
 0x492   :  { %v786_v55 = vmax.f32 %v777_v48, %v782_v41 }
 0x494   :  { %v787_v57 = vmax.f32 %v786_v55, %v785_v56 }
 0x496   :  { %v788_v54 = vsub.f32 %v777_v48, %v787_v57  ;;  %v791_v63 = vsub.f32 %v782_v41, %v787_v57  ;;  %v795_v39 = vsub.f32 %v785_v56, %v787_v57  ;;  %v799_v6 = vadd.f32 %v787_v57, %v1505_v35 }
 0x498   :  { %v789_v38 = vmul.f32 1.442695, %v788_v54  ;;  %v792_v59 = vmul.f32 1.442695, %v791_v63  ;;  %v796_v2 = vmul.f32 1.442695, %v795_v39 }
 0x49a   :  { %1031 = vpow2.f32 %v789_v38 }
 0x49b   :  { %1033 = vpow2.f32 %v792_v59 }
 0x49c   :  { %1035 = vpow2.f32 %v796_v2 }
 0x4a0   :  { %v1032_v46 = vpop.eup %1031 }
 0x4a1   :  { %v1034_v3 = vpop.eup %1033 }
 0x4a2   :  { %v794_v47 = vadd.f32 %v1034_v3, %v1032_v46  ;;  %v1036_v50 = vpop.eup %1035 }
 0x4a4   :  { %v798_v4 = vadd.f32 %v1036_v50, %v794_v47 }
 0x4a6   :  { %1037 = vlog2.f32 %v798_v4 }
 0x4ac   :  { %v1038_v0 = vpop.eup %1037 }
 0x4ad   :  { %v801_v61 = vmul.f32 0.6931472, %v1038_v0 }
 0x4af   :  { %v802_v7 = vadd.f32 %v801_v61, %v799_v6 }
 0x4b1   :  { %808 = vrot.lane.b32.xlu0 %v802_v7, %s1137_s3  ;;  %805 = vrot.lane.b32.xlu1 %v802_v7, %s1138_s28 }
 0x4b9   :  { %829 = vperm.xlu1 %958, %v1354_v17  }
 0x523   :  { %v809_v8 = vpop.permute.xlu0 %808  ;;  %v806_v9 = vpop.permute.xlu1 %805 }
 0x524   :  { %v807_v10 = vsel %vm640_vm9, %v806_v9, -1e+30  ;;  %v810_v11 = vsel %vm50_vm10, %v809_v8, -1e+30 }
 0x525   :  { %v811_v45 = vmax.f32 %v802_v7, %v807_v10 }
 0x527   :  { %v812_v12 = vmax.f32 %v811_v45, %v810_v11 }
 0x529   :  { %v813_v13 = vsub.f32 %v802_v7, %v812_v12  ;;  %v816_v35 = vsub.f32 %v807_v10, %v812_v12  ;;  %v820_v14 = vsub.f32 %v810_v11, %v812_v12  ;;  %v824_v23 = vadd.f32 %v812_v12, %v1502_v58 }
 0x52b   :  { %v814_v15 = vmul.f32 1.442695, %v813_v13  ;;  %v817_v16 = vmul.f32 1.442695, %v816_v35  ;;  %v821_v18 = vmul.f32 1.442695, %v820_v14  ;;  %v830_v22 = vpop.permute.xlu1 %829 }
 0x52c   :  { %vm831_vm12 = vcmp.eq.s32.totalorder %v1388_v1, %v830_v22 }
 0x52d   :  { %1039 = vpow2.f32 %v814_v15  ;;  %vm838_vm14 = vmor %vm831_vm12, %vm837_vm13 }
 0x52e   :  { %1041 = vpow2.f32 %v817_v16 }
 0x52f   :  { %1043 = vpow2.f32 %v821_v18 }
 0x533   :  { %v1040_v17 = vpop.eup %1039 }
 0x534   :  { %v1042_v19 = vpop.eup %1041 }
 0x535   :  { %v819_v20 = vadd.f32 %v1042_v19, %v1040_v17  ;;  %v1044_v21 = vpop.eup %1043 }
 0x537   :  { %v823_v43 = vadd.f32 %v1044_v21, %v819_v20 }
 0x539   :  { %1045 = vlog2.f32 %v823_v43 }
 0x53f   :  { %v1046_v60 = vpop.eup %1045 }
 0x540   :  { %v826_v24 = vmul.f32 0.6931472, %v1046_v60 }
 0x542   :  { %v827_v25 = vadd.f32 %v826_v24, %v824_v23 }
 0x544   :  { %v839_v26 = vsel %vm838_vm14, %v827_v25, -1e+30 }
 0x545   :  { %840 = vmax.xlane.f32.xlu0 %v839_v26 }
 0x5b8   :  { %v841_v5 = vpop.xlane.xlu0 %840 }
 0x5b9   :  { %v842_v27 = vsub.f32 %v839_v26, %v841_v5 }
 0x5bb   :  { %v843_v29 = vmul.f32 1.442695, %v842_v27 }
 0x5bd   :  { %1047 = vpow2.f32 %v843_v29 }
 0x5c3   :  { %v1048_v52 = vpop.eup %1047 }
 0x5c4   :  { %845 = vadd.xlane.f32.xlu2 %v1048_v52 }
 0x637   :  { %v846_v30 = vpop.xlane.xlu2 %845 }
 0x638   :  { %1049 = vlog2.f32 %v846_v30 }
 0x63e   :  { %v1050_v31 = vpop.eup %1049 }
 0x63f   :  { %v848_v1 = vmul.f32 0.6931472, %v1050_v31 }
 0x641   :  { %v849_v32 = vadd.f32 %v848_v1, %v841_v5 }
 0x643   :  { %v850_v34 = vsub.f32 0.0, %v849_v32  ;;  %vm851_vm15 = vcmp.lt.f32.partialorder %v849_v32, -1e+29 }
 0x645   :  { %v852_v58 = vsel %vm851_vm15, 0.0, %v850_v34 }
 0x646   :  { %853 = vst [vmem:[#allocation8] sm:$0xff] %v852_v58 }
 0x647   :  { %864 = dma.vmem_to_hbm [thread:$0]  %s860_s30, 128, %s862_s7, [#allocation5]  }
 0x648   :  { %1127 = dma.done.wait [#allocation5], 128  }
 0x649   :  { %1128 = vsyncadd [#allocation5], 4294967168 }
 0x64a   :  { %869 = vsyncpa [#allocation4], 1 }
 0x64b   :  { %870 = vsyncpa [#allocation7], 1 }
 0x64c   :  { %871 = vsyncpa [#allocation5], 1 }

</bundles_post_ra>
